<compile_context>
chip_gen: v7x
topology: tpu7x:2x2x1
jax: 0.10.0
libtpu: 0.0.40
codegen_flags: <defaults>
</compile_context>

<pallas_src>
import functools

import jax
import jax.numpy as jnp
from jax.experimental import pallas as pl
from jax.experimental.pallas import tpu as pltpu

_LOG2 = 0.6931471805599453  # math.log(2.0), matches torch.log(torch.tensor(2.0))
_LANE = 128
_WIDE = 1024  # 8 x 128: wide, lane-dense last dim for the bulk view


def _msoftplus_kernel(x_ref, o_ref):
    x = x_ref[...]
    # PyTorch nn.Softplus(beta=1, threshold=20): linear above threshold,
    # numerically stable log(1 + exp(x)) otherwise. Compute in f32.
    xf = x.astype(jnp.float32)
    stable = jnp.maximum(xf, 0.0) + jnp.log1p(jnp.exp(-jnp.abs(xf)))
    sp = jnp.where(xf > 20.0, xf, stable)
    o_ref[...] = (sp - _LOG2).astype(o_ref.dtype)


def _msoftplus_jnp(x):
    # Same math, plain jnp (used for sub-tile tails / tiny tensors and as ref).
    xf = x.astype(jnp.float32)
    stable = jnp.maximum(xf, 0.0) + jnp.log1p(jnp.exp(-jnp.abs(xf)))
    sp = jnp.where(xf > 20.0, xf, stable)
    return (sp - _LOG2).astype(x.dtype)


def _round_up(a, b):
    return ((a + b - 1) // b) * b


@functools.lru_cache(maxsize=1)
def _tpu_config():
    """Return (tensorcores_per_device, max_block_bytes)."""
    ncores = 1
    max_block_bytes = 4 << 20  # 4 MiB blocks ~ best HBM-roofline fraction on v5e/v6e
    kind = ""
    try:
        kind = jax.devices()[0].device_kind.lower()
    except Exception:  # pragma: no cover - defensive
        pass
    try:
        info = pltpu.get_tpu_info()
        for attr in ("num_cores", "core_count", "num_tensorcores",
                     "tensorcores_per_chip", "num_cores_per_chip"):
            v = getattr(info, attr, None)
            if isinstance(v, int) and v > 0:
                ncores = v
                break
    except Exception:  # pragma: no cover - defensive
        pass
    if ncores == 1:
        # Device-kind fallback for multi-TensorCore parts.
        if ("v7" in kind) or ("7x" in kind) or ("v4" in kind):
            ncores = 2
        elif ("v5" in kind) and ("lite" not in kind) and ("v5e" not in kind):
            ncores = 2  # v5p megacore
    # v7x: only 64 MiB physical VMEM -> keep blocks at 2 MiB there.
    if ("v7" in kind) or ("7x" in kind):
        max_block_bytes = 2 << 20
    return ncores, max_block_bytes


def msoftplus(x):
    """Apply softplus(x) - log(2) elementwise. x: any shape (e.g. NCHW)."""
    orig_shape = x.shape
    dtype = x.dtype
    n = x.size
    if n == 0:
        return x

    itemsize = jnp.dtype(dtype).itemsize
    # Sublane pack per vreg tile: 8 rows for 32-bit, 16 for 16-bit, 32 for 8-bit.
    pack = max(8, 32 // max(int(itemsize), 1))

    ncores, max_block_bytes = _tpu_config()

    flat = x.reshape(-1)

    # Wide lane-dense view when there is enough bulk, else 128 lanes.
    wide = _WIDE if n >= pack * _WIDE else _LANE
    unit = pack * wide
    bulk = (n // unit) * unit

    if bulk == 0:
        # Tiny tensor: no Pallas launch; one fused XLA elementwise op.
        return _msoftplus_jnp(flat).reshape(orig_shape)

    rows = bulk // wide  # multiple of `pack` by construction

    # Block sizing: as big as allowed, then split so every TensorCore gets
    # balanced work (and >= 2 blocks/core when there is enough work).
    max_tile_rows = max(pack, (max_block_bytes // (wide * itemsize)) // pack * pack)
    nblocks = pl.cdiv(rows, max_tile_rows)
    if ncores > 1:
        min_blocks = ncores
        if rows >= 8 * ncores * pack:
            min_blocks = 2 * ncores
        nblocks = max(nblocks, min_blocks)
    nblocks = min(nblocks, rows // pack)
    tile_r = _round_up(pl.cdiv(rows, nblocks), pack)
    grid = (pl.cdiv(rows, tile_r),)

    x2 = flat.reshape(rows, wide) if bulk == n else flat[:bulk].reshape(rows, wide)

    out2 = pl.pallas_call(
        _msoftplus_kernel,
        out_shape=jax.ShapeDtypeStruct((rows, wide), dtype),
        grid=grid,
        in_specs=[pl.BlockSpec((tile_r, wide), lambda i: (i, 0))],
        out_specs=pl.BlockSpec((tile_r, wide), lambda i: (i, 0)),
        compiler_params=pltpu.CompilerParams(
            dimension_semantics=("parallel",),
            vmem_limit_bytes=32 << 20,  # explicit; > v5e's 16 MiB default, safe on v7x
        ),
    )(x2)

    out_flat = out2.reshape(-1)
    tail = n - bulk
    if tail:
        # < unit leftover elements: tiny plain-jnp epilogue, then stitch.
        out_tail = _msoftplus_jnp(flat[bulk:])
        out_flat = jnp.concatenate([out_flat, out_tail])
    return out_flat.reshape(orig_shape)


if __name__ == "__main__":
    key = jax.random.PRNGKey(0)
    k1, k2, k3, k4 = jax.random.split(key, 4)

    # 1) NCHW input, small shape consistent with typical INR/conv usage.
    x = jax.random.normal(k1, (2, 4, 16, 16), dtype=jnp.float32) * 5.0
    out = jax.block_until_ready(msoftplus(x))
    ref = _msoftplus_jnp(x)
    assert out.shape == x.shape
    assert jnp.allclose(out, ref, atol=1e-6, rtol=1e-6)

    # 2) Non-128-divisible size with a kernel bulk + jnp tail.
    x_odd = jax.random.normal(k2, (5, 17, 31), dtype=jnp.float32) * 5.0
    out_odd = jax.block_until_ready(msoftplus(x_odd))
    ref_odd = _msoftplus_jnp(x_odd)
    assert out_odd.shape == x_odd.shape
    assert jnp.allclose(out_odd, ref_odd, atol=1e-6, rtol=1e-6)

    # 3) Larger-but-still-small tensor exercising the 1024-lane-wide path.
    x_wide = jax.random.normal(k3, (4, 8, 32, 32), dtype=jnp.float32) * 5.0
    out_wide = jax.block_until_ready(msoftplus(x_wide))
    ref_wide = _msoftplus_jnp(x_wide)
    assert out_wide.shape == x_wide.shape
    assert jnp.allclose(out_wide, ref_wide, atol=1e-6, rtol=1e-6)

    # 4) bf16 input (dtype-aware sublane pack; f32 internal math then downcast).
    x_bf = (jax.random.normal(k4, (2, 4, 16, 16), dtype=jnp.float32) * 5.0).astype(jnp.bfloat16)
    out_bf = jax.block_until_ready(msoftplus(x_bf))
    ref_bf = _msoftplus_jnp(x_bf)
    assert out_bf.shape == x_bf.shape
    assert jnp.allclose(out_bf.astype(jnp.float32), ref_bf.astype(jnp.float32),
                        atol=1e-2, rtol=1e-2)

    print("KERNEL_OK")
</pallas_src>

<mosaic_0001>
module attributes {stable_mosaic.version = 11 : i64} {
  func.func @_msoftplus_kernel(%arg0: i32, %arg1: memref<16x128xf32, #tpu.memory_space<vmem>>, %arg2: memref<16x128xf32, #tpu.memory_space<vmem>>) attributes {dimension_semantics = [#tpu.dimension_semantics<parallel>], iteration_bounds = array<i64: 1>, scalar_prefetch = 0 : i64, scratch_operands = 0 : i64, tpu.core_type = #tpu.core_type<tc>, window_params = [{transform_indices = @transform_0, window_bounds = array<i64: 16, 128>}, {transform_indices = @transform_1, window_bounds = array<i64: 16, 128>}]} {
    %c0 = arith.constant 0 : index
    %c0_0 = arith.constant 0 : index
    %0 = vector.load %arg1[%c0, %c0_0] : memref<16x128xf32, #tpu.memory_space<vmem>>, vector<16x128xf32>
    %cst = arith.constant 0.000000e+00 : f32
    %1 = vector.broadcast %cst : f32 to vector<16x128xf32>
    %2 = arith.maximumf %0, %1 : vector<16x128xf32>
    %3 = math.absf %0 : vector<16x128xf32>
    %cst_1 = arith.constant 0.000000e+00 : f32
    %4 = vector.broadcast %cst_1 : f32 to vector<16x128xf32>
    %5 = arith.subf %4, %3 : vector<16x128xf32>
    %6 = math.exp %5 : vector<16x128xf32>
    %7 = math.log1p %6 : vector<16x128xf32>
    %8 = arith.addf %2, %7 : vector<16x128xf32>
    %cst_2 = arith.constant 2.000000e+01 : f32
    %9 = vector.broadcast %cst_2 : f32 to vector<16x128xf32>
    %10 = arith.cmpf ogt, %0, %9 : vector<16x128xf32>
    %11 = arith.select %10, %0, %8 : vector<16x128xi1>, vector<16x128xf32>
    %cst_3 = arith.constant 0.693147182 : f32
    %12 = vector.broadcast %cst_3 : f32 to vector<16x128xf32>
    %13 = arith.subf %11, %12 : vector<16x128xf32>
    %c0_4 = arith.constant 0 : index
    %c0_5 = arith.constant 0 : index
    %14 = vector.load %arg2[%c0_4, %c0_5] : memref<16x128xf32, #tpu.memory_space<vmem>>, vector<16x128xf32>
    tpu.vector_store %arg2[%c0_4, %c0_5], %13 {strides = array<i32>} : memref<16x128xf32, #tpu.memory_space<vmem>>, vector<16x128xf32>,
    return
  }
  func.func @transform_0(%arg0: i32) -> (i32, i32) {
    %c0_i32 = arith.constant 0 : i32
    %c0_i32_0 = arith.constant 0 : i32
    return %arg0, %c0_i32 : i32, i32
  }
  func.func @transform_1(%arg0: i32) -> (i32, i32) {
    %c0_i32 = arith.constant 0 : i32
    %c0_i32_0 = arith.constant 0 : i32
    return %arg0, %c0_i32 : i32, i32
  }
}

</mosaic_0001>

<bundles_post_ra>
// kernel: tpu_custom_call.1
= control target key start
LH: loop header
LB: loop body
LE: loop exit
PB: predicated region body
PF: predicated region fallthrough
CT: control target
= control target key end

     0   :  { %6 = vsyncpa [#allocation3], 0  ;;  %s186_s0 = inlined_call_operand.hbm [shape: f32[16,128], index: 0, kind: input, shape index: {}]   ;;  %s187_s1 = inlined_call_operand.hbm [shape: f32[16,128], index: 1, kind: output, shape index: {}]  }
   0x1   :  { %7 = vsyncpa [#allocation4], 0  ;;  %s142_s6 = smov [#allocation2]   ;;  %s94_s10 = scalar_lea.hbm %s186_s0, 256 }
   0x2   :  { %s13_s7 = sshll.u32 %s142_s6, 4  ;;  %p95_p0 = scmp.ne.s32.totalorder %s186_s0, %s94_s10  ;;  %s14_s7 = int_to_ptr.vmem [resolvable:$true] %s13_s7 }
   0x3   :  { %p98_p1 = scmp.lt.u32.totalorder %s94_s10, %s186_s0 }
   0x5   :  { %p100_p2 = pnand %p98_p1, %p95_p0 }
   0x7   :  { %103 = shalt.err (!%p100_p2)
}
   0x8   :  { %s104_s15 = scalar_lea.vmem %s14_s7, 256  ;;  %p109_p4 = scmp.lt.s32.totalorder %s14_s7, %s14_s7 }
   0x9   :  { %p105_p3 = scmp.ne.s32.totalorder %s14_s7, %s104_s15  ;;  %p110_p5 = scmp.lt.s32.totalorder %s104_s15, %s104_s15 }
   0xb   :  { %p111_p6 = por %p110_p5, %p109_p4 }
   0xd   :  { %p112_p7 = pnand %p111_p6, %p105_p3 }
   0xf   :  { %115 = shalt.err (!%p112_p7)
}
  0x10   :  { %s143_s16 = smov 128   ;;  %s144_s17 = smov 8  }
  0x11   :  { %19 = dma.hbm_to_vmem [thread:$0]  %s186_s0, 256, %s14_s7, [#allocation3], %s143_s16, %s143_s16, %s144_s17  }
  0x12   :  { %138 = dma.done.wait [#allocation3], 256  }
  0x13   :  { %139 = vsyncadd [#allocation3], 4294967040  ;;  %v23_v0 = vld [vmem:[#allocation2] sm:$0xff]  ;;  %v24_v1 = vld [vmem:[#allocation2 + $0x8] sm:$0xff]  ;;  %s145_s0 = smov [#allocation5]  }
  0x14   :  { %v27_v2 = vand.u32 2147483647, %v23_v0  ;;  %v28_v3 = vand.u32 2147483647, %v24_v1  ;;  %v25_v20 = vmax.f32 %v23_v0, 0.0  ;;  %v26_v24 = vmax.f32 %v24_v1, 0.0 }
  0x15   :  { %vm55_vm2 = vcmp.gt.f32.partialorder %v23_v0, 20.0  ;;  %vm56_vm3 = vcmp.gt.f32.partialorder %v24_v1, 20.0  ;;  %s68_s20 = sshll.u32 %s145_s0, 4  ;;  %s69_s20 = int_to_ptr.vmem [resolvable:$true] %s68_s20 }
  0x16   :  { %v29_v4 = vsub.f32 0.0, %v27_v2  ;;  %v30_v5 = vsub.f32 0.0, %v28_v3  ;;  %s116_s21 = scalar_lea.vmem %s69_s20, 256  ;;  %p121_p9 = scmp.lt.s32.totalorder %s69_s20, %s69_s20 }
  0x17   :  { %p117_p8 = scmp.ne.s32.totalorder %s69_s20, %s116_s21  ;;  %p122_p10 = scmp.lt.s32.totalorder %s116_s21, %s116_s21 }
  0x18   :  { %v31_v6 = vmul.f32 1.442695, %v29_v4  ;;  %v33_v7 = vmul.f32 1.442695, %v30_v5 }
  0x19   :  { %p123_p11 = por %p122_p10, %p121_p9 }
  0x1a   :  { %86 = vpow2.f32 %v31_v6 }
  0x1b   :  { %88 = vpow2.f32 %v33_v7  ;;  %p124_p12 = pnand %p123_p11, %p117_p8 }
  0x24   :  { %v87_v8 = vpop.eup %86 }
  0x25   :  { %v89_v9 = vpop.eup %88  ;;  %v35_v10 = vadd.f32 1.0, %v87_v8  ;;  %v38_v12 = vmul.f32 -0.5, %v87_v8  ;;  %v41_v15 = vand.u32 2147483647, %v87_v8 }
  0x26   :  { %v44_v11 = vadd.f32 1.0, %v89_v9  ;;  %v47_v13 = vmul.f32 -0.5, %v89_v9  ;;  %v50_v17 = vand.u32 2147483647, %v89_v9 }
  0x27   :  { %90 = vlog2.f32 %v35_v10  ;;  %v39_v14 = vadd.f32 1.0, %v38_v12  ;;  %vm42_vm0 = vcmp.lt.f32.partialorder %v41_v15, 0.0004427343 }
  0x28   :  { %92 = vlog2.f32 %v44_v11  ;;  %v48_v16 = vadd.f32 1.0, %v47_v13  ;;  %vm51_vm1 = vcmp.lt.f32.partialorder %v50_v17, 0.0004427343 }
  0x29   :  { %v40_v18 = vmul.f32 %v87_v8, %v39_v14 }
  0x2a   :  { %v49_v21 = vmul.f32 %v89_v9, %v48_v16 }
  0x31   :  { %v91_v19 = vpop.eup %90 }
  0x32   :  { %v93_v22 = vpop.eup %92  ;;  %v37_v23 = vmul.f32 0.6931472, %v91_v19 }
  0x33   :  { %v46_v25 = vmul.f32 0.6931472, %v93_v22 }
  0x34   :  { %v43_v26 = vsel %vm42_vm0, %v40_v18, %v37_v23 }
  0x35   :  { %v53_v27 = vadd.f32 %v43_v26, %v25_v20  ;;  %v52_v28 = vsel %vm51_vm1, %v49_v21, %v46_v25 }
  0x36   :  { %v54_v29 = vadd.f32 %v52_v28, %v26_v24 }
  0x37   :  { %v57_v30 = vsel %vm55_vm2, %v23_v0, %v53_v27 }
  0x38   :  { %v80_v31 = vadd.f32 -0.6931472, %v57_v30  ;;  %v58_v32 = vsel %vm56_vm3, %v24_v1, %v54_v29 }
  0x39   :  { %v81_v33 = vadd.f32 -0.6931472, %v58_v32 }
  0x3a   :  { %61 = vst [vmem:[#allocation5] sm:$0xff] %v80_v31 }
  0x3b   :  { %62 = vst [vmem:[#allocation5 + $0x8] sm:$0xff] %v81_v33 }
  0x3c   :  { %127 = shalt.err (!%p124_p12)
}
  0x3d   :  { %s128_s24 = scalar_lea.hbm %s187_s1, 256 }
  0x3e   :  { %p129_p13 = scmp.ne.s32.totalorder %s187_s1, %s128_s24  ;;  %p132_p0 = scmp.lt.u32.totalorder %s128_s24, %s187_s1 }
  0x40   :  { %p134_p1 = pnand %p132_p0, %p129_p13 }
  0x42   :  { %137 = shalt.err (!%p134_p1)
}
  0x43   :  { %74 = dma.vmem_to_hbm [thread:$0]  %s69_s20, 256, %s187_s1, [#allocation4], %s143_s16, %s143_s16, %s144_s17  }
  0x44   :  { %140 = dma.done.wait [#allocation4], 256  }
  0x45   :  { %141 = vsyncadd [#allocation4], 4294967040 }
  0x46   :  { %78 = vsyncpa [#allocation3], 1 }
  0x47   :  { %79 = vsyncpa [#allocation4], 1 }

</bundles_post_ra>
